<compile_context>
chip_gen: v5e
topology: v5e:2x2
jax: 0.10.0
libtpu: 0.0.40
codegen_flags: <defaults>
</compile_context>

<pallas_src>
import functools

import jax
import jax.numpy as jnp
from jax.experimental import pallas as pl
from jax.experimental.pallas import tpu as pltpu


def _block_kernel(x_ref, w1_ref, w2_ref, w3_ref, m1_ref, m3_ref, o_ref, *, W):
    # x_ref / o_ref: (C, H*W)  — one batch image (grid iterates over N).
    # w*_ref:        (C, 9*C + 1) conv weights, bias folded in as last column.
    # m*_ref:        (9*C + 1, H*W) precomputed tap-validity masks
    #                (last row = 1 for the bias tap); m1 = dil 1, m3 = dil 3.
    C, HW = x_ref.shape
    x = x_ref[...]
    ones_row = jnp.ones((1, HW), dtype=jnp.float32)     # bias tap (hoisted)

    def conv3x3(inp, w_ref, m_ref, dil):
        # 9 shifted taps via XLU lane rolls; out-of-bounds taps are zeroed by
        # the precomputed mask with ONE multiply (no iota/compare VPU work).
        taps = []
        for kh in range(3):
            for kw in range(3):
                off = ((kh - 1) * W + (kw - 1)) * dil    # static lane offset
                s = (-off) % HW
                taps.append(pltpu.roll(inp, shift=s, axis=1) if s else inp)
        taps.append(ones_row)                            # bias tap
        stack = jnp.concatenate(taps, axis=0) * m_ref[...]   # (9*C+1, HW)
        # Single MXU matmul per conv (conv + bias together).
        return jnp.dot(w_ref[...], stack, preferred_element_type=jnp.float32)

    inv_hw = jnp.float32(1.0 / HW)

    def inorm(y, eps=1e-5):
        # One-pass InstanceNorm2d per (n, c): E[y] and E[y^2] are independent
        # lane reductions; biased variance, eps=1e-5 (PyTorch default).
        mean = jnp.sum(y, axis=-1, keepdims=True) * inv_hw
        msq = jnp.sum(y * y, axis=-1, keepdims=True) * inv_hw
        var = msq - mean * mean
        return (y - mean) * jax.lax.rsqrt(var + eps)

    relu = lambda t: jnp.maximum(t, jnp.float32(0.0))

    # conv1 (dil=1) -> IN -> relu
    out1 = relu(inorm(conv3x3(x, w1_ref, m1_ref, 1)))
    # conv2 (dil=3) -> IN, + residual, relu
    out = relu(inorm(conv3x3(out1, w2_ref, m3_ref, 3)) + x)
    # conv3 (dil=1) -> IN, + out1, relu
    # TODO(synk): is_dropout=True path (Dropout p=0.2) not implemented; module default is off.
    out = relu(inorm(conv3x3(out, w3_ref, m1_ref, 1)) + out1)

    o_ref[...] = out


def residual_block(x, w1, b1, w2, b2, w3, b3):
    # x: (N, C, H, W) float32; w*: (C, C, 3, 3); b*: (C,)
    N, C, H, W = x.shape
    HW = H * W
    K = 9 * C + 1                       # 9 taps * C input channels + bias tap
    x3 = x.reshape(N, C, HW)

    def prep_w(w, b):
        # (Cout, Cin, 3, 3) -> (Cout, 9*Cin) with (tap-major, ci-minor)
        # columns, plus the bias as one extra column (matches the ones tap).
        wm = jnp.transpose(w, (0, 2, 3, 1)).reshape(C, 9 * C)
        return jnp.concatenate([wm, b[:, None]], axis=1)          # (C, K)

    def build_mask(dil):
        # Precomputed tap-validity masks: row t*C + c is the spatial validity
        # of tap t (same for every channel); last row = 1 for the bias tap.
        hh = jnp.arange(H).reshape(H, 1)
        ww = jnp.arange(W).reshape(1, W)
        rows = []
        for kh in range(3):
            for kw in range(3):
                dy, dx = (kh - 1) * dil, (kw - 1) * dil
                valid = ((hh + dy >= 0) & (hh + dy < H) &
                         (ww + dx >= 0) & (ww + dx < W))
                rows.append(jnp.broadcast_to(valid.reshape(1, HW), (C, HW)))
        rows.append(jnp.ones((1, HW), dtype=bool))                 # bias tap
        return jnp.concatenate(rows, axis=0).astype(jnp.float32)   # (K, HW)

    w1p, w2p, w3p = prep_w(w1, b1), prep_w(w2, b2), prep_w(w3, b3)
    mask1, mask3 = build_mask(1), build_mask(3)

    x_spec = pl.BlockSpec((None, C, HW), lambda n: (n, 0, 0))
    w_spec = pl.BlockSpec((C, K), lambda n: (0, 0))
    m_spec = pl.BlockSpec((K, HW), lambda n: (0, 0))

    flops = 3 * 2 * C * K * HW * N
    bytes_accessed = 4 * (2 * N * C * HW + 3 * C * K + 2 * K * HW)

    out = pl.pallas_call(
        functools.partial(_block_kernel, W=W),
        out_shape=jax.ShapeDtypeStruct((N, C, HW), jnp.float32),
        grid_spec=pltpu.PrefetchScalarGridSpec(
            num_scalar_prefetch=0,
            grid=(N,),
            in_specs=[x_spec, w_spec, w_spec, w_spec, m_spec, m_spec],
            out_specs=x_spec,
        ),
        compiler_params=pltpu.CompilerParams(
            dimension_semantics=("parallel",)),
        cost_estimate=pl.CostEstimate(
            flops=flops, transcendentals=3 * N * C,
            bytes_accessed=bytes_accessed),
    )(x3, w1p, w2p, w3p, mask1, mask3)

    return out.reshape(N, C, H, W)


def _reference(x, w1, b1, w2, b2, w3, b3):
    # Pure-JAX reference for verification.
    def conv(inp, w, b, d):
        y = jax.lax.conv_general_dilated(
            inp, w, window_strides=(1, 1),
            padding=((d, d), (d, d)), rhs_dilation=(d, d),
            dimension_numbers=("NCHW", "OIHW", "NCHW"))
        return y + b.reshape(1, -1, 1, 1)

    def inorm(y, eps=1e-5):
        m = y.mean(axis=(2, 3), keepdims=True)
        v = ((y - m) ** 2).mean(axis=(2, 3), keepdims=True)
        return (y - m) * jax.lax.rsqrt(v + eps)

    out1 = jax.nn.relu(inorm(conv(x, w1, b1, 1)))
    out = jax.nn.relu(inorm(conv(out1, w2, b2, 3)) + x)
    out = jax.nn.relu(inorm(conv(out, w3, b3, 1)) + out1)
    return out


if __name__ == "__main__":
    N, C, H, W = 2, 4, 16, 16   # in_channels == out_channels (identity residual)
    key = jax.random.PRNGKey(0)
    kx, k1, k2, k3, kb1, kb2, kb3 = jax.random.split(key, 7)

    x = jax.random.normal(kx, (N, C, H, W), dtype=jnp.float32)
    w1 = 0.2 * jax.random.normal(k1, (C, C, 3, 3), dtype=jnp.float32)
    w2 = 0.2 * jax.random.normal(k2, (C, C, 3, 3), dtype=jnp.float32)
    w3 = 0.2 * jax.random.normal(k3, (C, C, 3, 3), dtype=jnp.float32)
    b1 = 0.1 * jax.random.normal(kb1, (C,), dtype=jnp.float32)
    b2 = 0.1 * jax.random.normal(kb2, (C,), dtype=jnp.float32)
    b3 = 0.1 * jax.random.normal(kb3, (C,), dtype=jnp.float32)

    fwd = jax.jit(residual_block)   # hoists weight/mask prep into one executable
    out = jax.block_until_ready(fwd(x, w1, b1, w2, b2, w3, b3))

    ref = jax.block_until_ready(_reference(x, w1, b1, w2, b2, w3, b3))
    assert out.shape == ref.shape == (N, C, H, W)
    assert jnp.allclose(out, ref, atol=1e-2, rtol=1e-2), (
        float(jnp.max(jnp.abs(out - ref))))

    print("KERNEL_OK")
</pallas_src>

<mosaic_0001>
module attributes {stable_mosaic.version = 11 : i64} {
  func.func @_block_kernel(%arg0: i32, %arg1: memref<1x4x256xf32, #tpu.memory_space<vmem>>, %arg2: memref<4x37xf32, #tpu.memory_space<vmem>>, %arg3: memref<4x37xf32, #tpu.memory_space<vmem>>, %arg4: memref<4x37xf32, #tpu.memory_space<vmem>>, %arg5: memref<37x256xf32, #tpu.memory_space<vmem>>, %arg6: memref<37x256xf32, #tpu.memory_space<vmem>>, %arg7: memref<1x4x256xf32, #tpu.memory_space<vmem>>) attributes {dimension_semantics = [#tpu.dimension_semantics<parallel>], iteration_bounds = array<i64: 2>, scalar_prefetch = 0 : i64, scratch_operands = 0 : i64, tpu.core_type = #tpu.core_type<tc>, window_params = [{transform_indices = @transform_0, window_bounds = array<i64: 1, 4, 256>}, {pipeline_mode = #tpu.pipeline_mode<synchronous>, transform_indices = @transform_1, window_bounds = array<i64: 4, 37>}, {pipeline_mode = #tpu.pipeline_mode<synchronous>, transform_indices = @transform_2, window_bounds = array<i64: 4, 37>}, {pipeline_mode = #tpu.pipeline_mode<synchronous>, transform_indices = @transform_3, window_bounds = array<i64: 4, 37>}, {pipeline_mode = #tpu.pipeline_mode<synchronous>, transform_indices = @transform_4, window_bounds = array<i64: 37, 256>}, {pipeline_mode = #tpu.pipeline_mode<synchronous>, transform_indices = @transform_5, window_bounds = array<i64: 37, 256>}, {transform_indices = @transform_6, window_bounds = array<i64: 1, 4, 256>}]} {
    %c0 = arith.constant 0 : index
    %c0_0 = arith.constant 0 : index
    %c0_1 = arith.constant 0 : index
    %0 = vector.load %arg1[%c0, %c0_0, %c0_1] : memref<1x4x256xf32, #tpu.memory_space<vmem>>, vector<1x4x256xf32>
    %1 = vector.shape_cast %0 : vector<1x4x256xf32> to vector<4x256xf32>
    %cst = arith.constant 1.000000e+00 : f32
    %2 = vector.broadcast %cst : f32 to vector<1x256xf32>
    %c17_i32 = arith.constant 17 : i32
    %3 = tpu.dynamic_rotate %1 by %c17_i32 dim 1 : vector<4x256xf32>, i32 -> vector<4x256xf32>
    %c16_i32 = arith.constant 16 : i32
    %4 = tpu.dynamic_rotate %1 by %c16_i32 dim 1 : vector<4x256xf32>, i32 -> vector<4x256xf32>
    %c15_i32 = arith.constant 15 : i32
    %5 = tpu.dynamic_rotate %1 by %c15_i32 dim 1 : vector<4x256xf32>, i32 -> vector<4x256xf32>
    %c1_i32 = arith.constant 1 : i32
    %6 = tpu.dynamic_rotate %1 by %c1_i32 dim 1 : vector<4x256xf32>, i32 -> vector<4x256xf32>
    %c255_i32 = arith.constant 255 : i32
    %7 = tpu.dynamic_rotate %1 by %c255_i32 dim 1 : vector<4x256xf32>, i32 -> vector<4x256xf32>
    %c241_i32 = arith.constant 241 : i32
    %8 = tpu.dynamic_rotate %1 by %c241_i32 dim 1 : vector<4x256xf32>, i32 -> vector<4x256xf32>
    %c240_i32 = arith.constant 240 : i32
    %9 = tpu.dynamic_rotate %1 by %c240_i32 dim 1 : vector<4x256xf32>, i32 -> vector<4x256xf32>
    %c239_i32 = arith.constant 239 : i32
    %10 = tpu.dynamic_rotate %1 by %c239_i32 dim 1 : vector<4x256xf32>, i32 -> vector<4x256xf32>
    %11 = tpu.concatenate %3, %4, %5, %6, %1, %7, %8, %9, %10, %2 in 0 : vector<4x256xf32>, vector<4x256xf32>, vector<4x256xf32>, vector<4x256xf32>, vector<4x256xf32>, vector<4x256xf32>, vector<4x256xf32>, vector<4x256xf32>, vector<4x256xf32>, vector<1x256xf32> -> vector<37x256xf32>
    %c0_2 = arith.constant 0 : index
    %c0_3 = arith.constant 0 : index
    %12 = vector.load %arg5[%c0_2, %c0_3] : memref<37x256xf32, #tpu.memory_space<vmem>>, vector<37x256xf32>
    %13 = arith.mulf %11, %12 : vector<37x256xf32>
    %c0_4 = arith.constant 0 : index
    %c0_5 = arith.constant 0 : index
    %14 = vector.load %arg2[%c0_4, %c0_5] : memref<4x37xf32, #tpu.memory_space<vmem>>, vector<4x37xf32>
    %cst_6 = arith.constant dense<0.000000e+00> : vector<4x256xf32>
    %15 = tpu.matmul %14, %13, %cst_6 {dimension_numbers = #tpu.dot_dimension_numbers<[1], [0], [0], [1], [0, 0, 1, 1], [], []>} : vector<4x37xf32>, vector<37x256xf32>, vector<4x256xf32> -> vector<4x256xf32>
    %cst_7 = arith.constant dense<0.000000e+00> : vector<4xf32>
    %16 = vector.multi_reduction <add>, %15, %cst_7 [1] : vector<4x256xf32> to vector<4xf32>
    %17 = vector.shape_cast %16 : vector<4xf32> to vector<4x1xf32>
    %cst_8 = arith.constant 3.906250e-03 : f32
    %18 = vector.broadcast %cst_8 : f32 to vector<4x1xf32>
    %19 = arith.mulf %17, %18 : vector<4x1xf32>
    %20 = arith.mulf %15, %15 : vector<4x256xf32>
    %cst_9 = arith.constant dense<0.000000e+00> : vector<4xf32>
    %21 = vector.multi_reduction <add>, %20, %cst_9 [1] : vector<4x256xf32> to vector<4xf32>
    %22 = vector.shape_cast %21 : vector<4xf32> to vector<4x1xf32>
    %cst_10 = arith.constant 3.906250e-03 : f32
    %23 = vector.broadcast %cst_10 : f32 to vector<4x1xf32>
    %24 = arith.mulf %22, %23 : vector<4x1xf32>
    %25 = arith.mulf %19, %19 : vector<4x1xf32>
    %26 = arith.subf %24, %25 : vector<4x1xf32>
    %27 = vector.broadcast %19 : vector<4x1xf32> to vector<4x256xf32>
    %28 = arith.subf %15, %27 : vector<4x256xf32>
    %cst_11 = arith.constant 9.99999974E-6 : f32
    %29 = vector.broadcast %cst_11 : f32 to vector<4x1xf32>
    %30 = arith.addf %26, %29 : vector<4x1xf32>
    %31 = math.rsqrt %30 : vector<4x1xf32>
    %32 = vector.broadcast %31 : vector<4x1xf32> to vector<4x256xf32>
    %33 = arith.mulf %28, %32 : vector<4x256xf32>
    %cst_12 = arith.constant 0.000000e+00 : f32
    %34 = vector.broadcast %cst_12 : f32 to vector<4x256xf32>
    %35 = arith.maximumf %33, %34 : vector<4x256xf32>
    %c51_i32 = arith.constant 51 : i32
    %36 = tpu.dynamic_rotate %35 by %c51_i32 dim 1 : vector<4x256xf32>, i32 -> vector<4x256xf32>
    %c48_i32 = arith.constant 48 : i32
    %37 = tpu.dynamic_rotate %35 by %c48_i32 dim 1 : vector<4x256xf32>, i32 -> vector<4x256xf32>
    %c45_i32 = arith.constant 45 : i32
    %38 = tpu.dynamic_rotate %35 by %c45_i32 dim 1 : vector<4x256xf32>, i32 -> vector<4x256xf32>
    %c3_i32 = arith.constant 3 : i32
    %39 = tpu.dynamic_rotate %35 by %c3_i32 dim 1 : vector<4x256xf32>, i32 -> vector<4x256xf32>
    %c253_i32 = arith.constant 253 : i32
    %40 = tpu.dynamic_rotate %35 by %c253_i32 dim 1 : vector<4x256xf32>, i32 -> vector<4x256xf32>
    %c211_i32 = arith.constant 211 : i32
    %41 = tpu.dynamic_rotate %35 by %c211_i32 dim 1 : vector<4x256xf32>, i32 -> vector<4x256xf32>
    %c208_i32 = arith.constant 208 : i32
    %42 = tpu.dynamic_rotate %35 by %c208_i32 dim 1 : vector<4x256xf32>, i32 -> vector<4x256xf32>
    %c205_i32 = arith.constant 205 : i32
    %43 = tpu.dynamic_rotate %35 by %c205_i32 dim 1 : vector<4x256xf32>, i32 -> vector<4x256xf32>
    %44 = tpu.concatenate %36, %37, %38, %39, %35, %40, %41, %42, %43, %2 in 0 : vector<4x256xf32>, vector<4x256xf32>, vector<4x256xf32>, vector<4x256xf32>, vector<4x256xf32>, vector<4x256xf32>, vector<4x256xf32>, vector<4x256xf32>, vector<4x256xf32>, vector<1x256xf32> -> vector<37x256xf32>
    %c0_13 = arith.constant 0 : index
    %c0_14 = arith.constant 0 : index
    %45 = vector.load %arg6[%c0_13, %c0_14] : memref<37x256xf32, #tpu.memory_space<vmem>>, vector<37x256xf32>
    %46 = arith.mulf %44, %45 : vector<37x256xf32>
    %c0_15 = arith.constant 0 : index
    %c0_16 = arith.constant 0 : index
    %47 = vector.load %arg3[%c0_15, %c0_16] : memref<4x37xf32, #tpu.memory_space<vmem>>, vector<4x37xf32>
    %cst_17 = arith.constant dense<0.000000e+00> : vector<4x256xf32>
    %48 = tpu.matmul %47, %46, %cst_17 {dimension_numbers = #tpu.dot_dimension_numbers<[1], [0], [0], [1], [0, 0, 1, 1], [], []>} : vector<4x37xf32>, vector<37x256xf32>, vector<4x256xf32> -> vector<4x256xf32>
    %cst_18 = arith.constant dense<0.000000e+00> : vector<4xf32>
    %49 = vector.multi_reduction <add>, %48, %cst_18 [1] : vector<4x256xf32> to vector<4xf32>
    %50 = vector.shape_cast %49 : vector<4xf32> to vector<4x1xf32>
    %cst_19 = arith.constant 3.906250e-03 : f32
    %51 = vector.broadcast %cst_19 : f32 to vector<4x1xf32>
    %52 = arith.mulf %50, %51 : vector<4x1xf32>
    %53 = arith.mulf %48, %48 : vector<4x256xf32>
    %cst_20 = arith.constant dense<0.000000e+00> : vector<4xf32>
    %54 = vector.multi_reduction <add>, %53, %cst_20 [1] : vector<4x256xf32> to vector<4xf32>
    %55 = vector.shape_cast %54 : vector<4xf32> to vector<4x1xf32>
    %cst_21 = arith.constant 3.906250e-03 : f32
    %56 = vector.broadcast %cst_21 : f32 to vector<4x1xf32>
    %57 = arith.mulf %55, %56 : vector<4x1xf32>
    %58 = arith.mulf %52, %52 : vector<4x1xf32>
    %59 = arith.subf %57, %58 : vector<4x1xf32>
    %60 = vector.broadcast %52 : vector<4x1xf32> to vector<4x256xf32>
    %61 = arith.subf %48, %60 : vector<4x256xf32>
    %cst_22 = arith.constant 9.99999974E-6 : f32
    %62 = vector.broadcast %cst_22 : f32 to vector<4x1xf32>
    %63 = arith.addf %59, %62 : vector<4x1xf32>
    %64 = math.rsqrt %63 : vector<4x1xf32>
    %65 = vector.broadcast %64 : vector<4x1xf32> to vector<4x256xf32>
    %66 = arith.mulf %61, %65 : vector<4x256xf32>
    %67 = arith.addf %66, %1 : vector<4x256xf32>
    %cst_23 = arith.constant 0.000000e+00 : f32
    %68 = vector.broadcast %cst_23 : f32 to vector<4x256xf32>
    %69 = arith.maximumf %67, %68 : vector<4x256xf32>
    %c17_i32_24 = arith.constant 17 : i32
    %70 = tpu.dynamic_rotate %69 by %c17_i32_24 dim 1 : vector<4x256xf32>, i32 -> vector<4x256xf32>
    %c16_i32_25 = arith.constant 16 : i32
    %71 = tpu.dynamic_rotate %69 by %c16_i32_25 dim 1 : vector<4x256xf32>, i32 -> vector<4x256xf32>
    %c15_i32_26 = arith.constant 15 : i32
    %72 = tpu.dynamic_rotate %69 by %c15_i32_26 dim 1 : vector<4x256xf32>, i32 -> vector<4x256xf32>
    %c1_i32_27 = arith.constant 1 : i32
    %73 = tpu.dynamic_rotate %69 by %c1_i32_27 dim 1 : vector<4x256xf32>, i32 -> vector<4x256xf32>
    %c255_i32_28 = arith.constant 255 : i32
    %74 = tpu.dynamic_rotate %69 by %c255_i32_28 dim 1 : vector<4x256xf32>, i32 -> vector<4x256xf32>
    %c241_i32_29 = arith.constant 241 : i32
    %75 = tpu.dynamic_rotate %69 by %c241_i32_29 dim 1 : vector<4x256xf32>, i32 -> vector<4x256xf32>
    %c240_i32_30 = arith.constant 240 : i32
    %76 = tpu.dynamic_rotate %69 by %c240_i32_30 dim 1 : vector<4x256xf32>, i32 -> vector<4x256xf32>
    %c239_i32_31 = arith.constant 239 : i32
    %77 = tpu.dynamic_rotate %69 by %c239_i32_31 dim 1 : vector<4x256xf32>, i32 -> vector<4x256xf32>
    %78 = tpu.concatenate %70, %71, %72, %73, %69, %74, %75, %76, %77, %2 in 0 : vector<4x256xf32>, vector<4x256xf32>, vector<4x256xf32>, vector<4x256xf32>, vector<4x256xf32>, vector<4x256xf32>, vector<4x256xf32>, vector<4x256xf32>, vector<4x256xf32>, vector<1x256xf32> -> vector<37x256xf32>
    %c0_32 = arith.constant 0 : index
    %c0_33 = arith.constant 0 : index
    %79 = vector.load %arg5[%c0_32, %c0_33] : memref<37x256xf32, #tpu.memory_space<vmem>>, vector<37x256xf32>
    %80 = arith.mulf %78, %79 : vector<37x256xf32>
    %c0_34 = arith.constant 0 : index
    %c0_35 = arith.constant 0 : index
    %81 = vector.load %arg4[%c0_34, %c0_35] : memref<4x37xf32, #tpu.memory_space<vmem>>, vector<4x37xf32>
    %cst_36 = arith.constant dense<0.000000e+00> : vector<4x256xf32>
    %82 = tpu.matmul %81, %80, %cst_36 {dimension_numbers = #tpu.dot_dimension_numbers<[1], [0], [0], [1], [0, 0, 1, 1], [], []>} : vector<4x37xf32>, vector<37x256xf32>, vector<4x256xf32> -> vector<4x256xf32>
    %cst_37 = arith.constant dense<0.000000e+00> : vector<4xf32>
    %83 = vector.multi_reduction <add>, %82, %cst_37 [1] : vector<4x256xf32> to vector<4xf32>
    %84 = vector.shape_cast %83 : vector<4xf32> to vector<4x1xf32>
    %cst_38 = arith.constant 3.906250e-03 : f32
    %85 = vector.broadcast %cst_38 : f32 to vector<4x1xf32>
    %86 = arith.mulf %84, %85 : vector<4x1xf32>
    %87 = arith.mulf %82, %82 : vector<4x256xf32>
    %cst_39 = arith.constant dense<0.000000e+00> : vector<4xf32>
    %88 = vector.multi_reduction <add>, %87, %cst_39 [1] : vector<4x256xf32> to vector<4xf32>
    %89 = vector.shape_cast %88 : vector<4xf32> to vector<4x1xf32>
    %cst_40 = arith.constant 3.906250e-03 : f32
    %90 = vector.broadcast %cst_40 : f32 to vector<4x1xf32>
    %91 = arith.mulf %89, %90 : vector<4x1xf32>
    %92 = arith.mulf %86, %86 : vector<4x1xf32>
    %93 = arith.subf %91, %92 : vector<4x1xf32>
    %94 = vector.broadcast %86 : vector<4x1xf32> to vector<4x256xf32>
    %95 = arith.subf %82, %94 : vector<4x256xf32>
    %cst_41 = arith.constant 9.99999974E-6 : f32
    %96 = vector.broadcast %cst_41 : f32 to vector<4x1xf32>
    %97 = arith.addf %93, %96 : vector<4x1xf32>
    %98 = math.rsqrt %97 : vector<4x1xf32>
    %99 = vector.broadcast %98 : vector<4x1xf32> to vector<4x256xf32>
    %100 = arith.mulf %95, %99 : vector<4x256xf32>
    %101 = arith.addf %100, %35 : vector<4x256xf32>
    %cst_42 = arith.constant 0.000000e+00 : f32
    %102 = vector.broadcast %cst_42 : f32 to vector<4x256xf32>
    %103 = arith.maximumf %101, %102 : vector<4x256xf32>
    %c0_43 = arith.constant 0 : index
    %c0_44 = arith.constant 0 : index
    %c0_45 = arith.constant 0 : index
    %104 = vector.load %arg7[%c0_43, %c0_44, %c0_45] : memref<1x4x256xf32, #tpu.memory_space<vmem>>, vector<1x4x256xf32>
    %105 = vector.shape_cast %104 : vector<1x4x256xf32> to vector<4x256xf32>
    %106 = vector.shape_cast %103 : vector<4x256xf32> to vector<1x4x256xf32>
    tpu.vector_store %arg7[%c0_43, %c0_44, %c0_45], %106 {strides = array<i32>} : memref<1x4x256xf32, #tpu.memory_space<vmem>>, vector<1x4x256xf32>,
    return
  }
  func.func @transform_0(%arg0: i32) -> (i32, i32, i32) {
    %c0_i32 = arith.constant 0 : i32
    %c0_i32_0 = arith.constant 0 : i32
    %c0_i32_1 = arith.constant 0 : i32
    return %arg0, %c0_i32, %c0_i32_0 : i32, i32, i32
  }
  func.func @transform_1(%arg0: i32) -> (i32, i32) {
    %c0_i32 = arith.constant 0 : i32
    %c0_i32_0 = arith.constant 0 : i32
    %c0_i32_1 = arith.constant 0 : i32
    return %c0_i32, %c0_i32_0 : i32, i32
  }
  func.func @transform_2(%arg0: i32) -> (i32, i32) {
    %c0_i32 = arith.constant 0 : i32
    %c0_i32_0 = arith.constant 0 : i32
    %c0_i32_1 = arith.constant 0 : i32
    return %c0_i32, %c0_i32_0 : i32, i32
  }
  func.func @transform_3(%arg0: i32) -> (i32, i32) {
    %c0_i32 = arith.constant 0 : i32
    %c0_i32_0 = arith.constant 0 : i32
    %c0_i32_1 = arith.constant 0 : i32
    return %c0_i32, %c0_i32_0 : i32, i32
  }
  func.func @transform_4(%arg0: i32) -> (i32, i32) {
    %c0_i32 = arith.constant 0 : i32
    %c0_i32_0 = arith.constant 0 : i32
    %c0_i32_1 = arith.constant 0 : i32
    return %c0_i32, %c0_i32_0 : i32, i32
  }
  func.func @transform_5(%arg0: i32) -> (i32, i32) {
    %c0_i32 = arith.constant 0 : i32
    %c0_i32_0 = arith.constant 0 : i32
    %c0_i32_1 = arith.constant 0 : i32
    return %c0_i32, %c0_i32_0 : i32, i32
  }
  func.func @transform_6(%arg0: i32) -> (i32, i32, i32) {
    %c0_i32 = arith.constant 0 : i32
    %c0_i32_0 = arith.constant 0 : i32
    %c0_i32_1 = arith.constant 0 : i32
    return %arg0, %c0_i32, %c0_i32_0 : i32, i32, i32
  }
}

</mosaic_0001>

<bundles_post_ra>
// kernel: residual_block.1
= control target key start
LH: loop header
LB: loop body
LE: loop exit
PB: predicated region body
PF: predicated region fallthrough
CT: control target
= control target key end

     0   :  { %s1049_s21 = smov 0   ;;  %s1379_s0 = inlined_call_operand.vmem [shape: f32[2,4,256], index: 0, kind: input, shape index: {}]   ;;  %s1380_s1 = inlined_call_operand.vmem [shape: f32[4,37], index: 1, kind: input, shape index: {}]   ;;  %s1381_s2 = inlined_call_operand.vmem [shape: f32[4,37], index: 2, kind: input, shape index: {}]   ;;  %s1382_s3 = inlined_call_operand.vmem [shape: f32[4,37], index: 3, kind: input, shape index: {}]   ;;  %s1383_s4 = inlined_call_operand.vmem [shape: f32[37,256], index: 4, kind: input, shape index: {}]   ;;  %s1384_s5 = inlined_call_operand.vmem [shape: f32[37,256], index: 5, kind: input, shape index: {}]   ;;  %s1385_s6 = inlined_call_operand.vmem [shape: f32[2,4,256], index: 6, kind: output, shape index: {}]  }
   0x1 LB: > { %s935_s22 = sadd.s32 4294967295, %s996_s21   ;;  %p939_p0 = scmp.ge.s32.totalorder %s996_s21, 1  ;;  %s996_s21 = sphi %s1049_s21, %s16_s21  }
   0x2   : > { %p212_p1 = scmp.lt.s32.totalorder %s996_s21, 3 }
   0x4   : > { %p213_p2 = pnand %p939_p0, %p212_p1 }
   0x5   : > { %p242_p3 = scmp.lt.s32.totalorder (!%p213_p2), %s935_s22, 1  ;;  %s998_s27 = smov (!%p213_p2), 16  }
   0x6   : > { %216 = sbr.rel (%p213_p2) target bundleno = 1442 (0x5a2), region = 44  ;;  %s999_s28 = smov (!%p213_p2), 15  }
   0x7   : > { %s1000_s29 = smov (!%p213_p2), 1   ;;  %s1001_s30 = smov (!%p213_p2), 127  }
   0x8   : > { %s1002_s7 = smov (!%p213_p2), 113   ;;  %s1003_s8 = smov (!%p213_p2), 112  }
   0x9   : > { %s1004_s9 = smov (!%p213_p2), 17   ;;  %s1005_s10 = smov (!%p213_p2), 111  }
   0xa   : > { %s1006_s20 = smov (!%p213_p2), 125   ;;  %s1007_s24 = smov (!%p213_p2), 83  }
   0xb   : > { %s1387_s22 = smov (!%p242_p3, %s935_s22), 1  ;;  %v263_v28 = vlaneseq  ;;  %vm381_vm6 = vcmask 1043456   ;;  %v1102_v42 = vld [vmem:[%s1383_s4 + $0x40] sm:$0x1f]  ;;  %vm417_vm7 = vcmask 1044480   ;;  %v1123_v51 = vld [vmem:[%s1383_s4 + $0x30] sm:$0xff] }
   0xc   : > { %s958_s23 = sshll.u32 %s1387_s22, 3  ;;  %v1107_v43 = vld [vmem:[%s1383_s4 + $0x48] sm:$0x1f]  ;;  %v1129_v53 = vld [vmem:[%s1383_s4 + $0x38] sm:$0xff]  ;;  %v1139_v58 = vld [vmem:[%s1383_s4 + $0x20] sm:$0xff]  ;;  %vm413_vm10 = vcmask 302080  }
   0xd   : > { %s246_s26 = scalar_lea.vmem %s1379_s0, %s958_s23  ;;  %v1083_v29 = vand.u32 127, %v263_v28  ;;  %s1008_s25 = smov 80  }
   0xe   : > { %v252_v0 = vld [vmem:[%s246_s26] sm:$0xff]  ;;  %s1009_s26 = smov 48   ;;  %s1010_s11 = smov 45  }
   0xf   : > { %254 = vst [vmem:[#allocation1] ss:$2 sm:$0xff] %v252_v0  ;;  %vm337_vm0 = vcmp.lt.s32.totalorder %v1083_v29, 112  ;;  %vm313_vm1 = vcmp.lt.s32.totalorder %v1083_v29, 127  ;;  %vm325_vm2 = vcmp.lt.s32.totalorder %v1083_v29, 113  ;;  %vm349_vm3 = vcmp.lt.s32.totalorder %v1083_v29, 111 }
  0x10   : > { %vm277_vm4 = vcmp.lt.s32.totalorder %v1083_v29, 16  ;;  %vm301_vm5 = vcmp.lt.s32.totalorder %v1083_v29, 1  ;;  %vm265_vm8 = vcmp.lt.s32.totalorder %v1083_v29, 17  ;;  %vm289_vm9 = vcmp.lt.s32.totalorder %v1083_v29, 15  ;;  %s1011_s12 = smov 51   ;;  %s1012_s13 = smov 77  }
  0x11   : > { %s1013_s14 = smov 3   ;;  %vm550_vm14 = vcmp.lt.s32.totalorder %v1083_v29, 77  ;;  %vm529_vm15 = vcmp.lt.s32.totalorder %v1083_v29, 125 }
  0x16   : > { %v255_v1 = vld.sshfl [vmem:[#allocation1] sm:$0xff pattern:$0x75316420]  ;;  %v256_v2 = vld.sshfl [vmem:[#allocation1 + $0x8] sm:$0xff pattern:$0x75316420] }
  0x17   : > { %268 = vst [vmem:[#allocation1] ss:$2 sm:$0xff] %v252_v0 }
  0x1e   : > { %v269_v3 = vld.sshfl [vmem:[#allocation1] sm:$0xff pattern:$0x75316420]  ;;  %v270_v4 = vld.sshfl [vmem:[#allocation1 + $0x8] sm:$0xff pattern:$0x75316420] }
  0x1f   : > { %280 = vst [vmem:[#allocation1] ss:$2 sm:$0xff] %v252_v0  ;;  %273 = vrot.lane.b32.xlu1 %v269_v3, %s998_s27  ;;  %275 = vrot.lane.b32.xlu2 %v270_v4, %s998_s27 }
  0x26   : > { %v281_v5 = vld.sshfl [vmem:[#allocation1] sm:$0xff pattern:$0x75316420]  ;;  %v282_v6 = vld.sshfl [vmem:[#allocation1 + $0x8] sm:$0xff pattern:$0x75316420] }
  0x27   : > { %285 = vrot.lane.b32.xlu0 %v281_v5, %s999_s28  ;;  %292 = vst [vmem:[#allocation1] ss:$2 sm:$0xff] %v252_v0 }
  0x2e   : > { %v294_v7 = vld.sshfl [vmem:[#allocation1 + $0x8] sm:$0xff pattern:$0x75316420]  ;;  %v293_v8 = vld.sshfl [vmem:[#allocation1] sm:$0xff pattern:$0x75316420] }
  0x2f   : > { %299 = vrot.lane.b32.xlu0 %v294_v7, %s1000_s29  ;;  %304 = vst [vmem:[#allocation1] ss:$2 sm:$0xff] %v252_v0  ;;  %297 = vrot.lane.b32.xlu2 %v293_v8, %s1000_s29 }
  0x36   : > { %v305_v9 = vld.sshfl [vmem:[#allocation1] sm:$0xff pattern:$0x75316420]  ;;  %v306_v10 = vld.sshfl [vmem:[#allocation1 + $0x8] sm:$0xff pattern:$0x75316420] }
  0x37   : > { %316 = vst [vmem:[#allocation1] ss:$2 sm:$0xff] %v252_v0  ;;  %309 = vrot.lane.b32.xlu2 %v305_v9, %s1001_s30 }
  0x3e   : > { %v317_v11 = vld.sshfl [vmem:[#allocation1] sm:$0xff pattern:$0x75316420]  ;;  %v318_v12 = vld.sshfl [vmem:[#allocation1 + $0x8] sm:$0xff pattern:$0x75316420] }
  0x3f   : > { %321 = vrot.lane.b32.xlu0 %v317_v11, %s1002_s7  ;;  %323 = vrot.lane.b32.xlu1 %v318_v12, %s1002_s7  ;;  %328 = vst [vmem:[#allocation1] ss:$2 sm:$0xff] %v252_v0 }
  0x40   : > { %311 = vrot.lane.b32.xlu2 %v306_v10, %s1001_s30 }
  0x46   : > { %v329_v13 = vld.sshfl [vmem:[#allocation1] sm:$0xff pattern:$0x75316420]  ;;  %v330_v14 = vld.sshfl [vmem:[#allocation1 + $0x8] sm:$0xff pattern:$0x75316420] }
  0x47   : > { %333 = vrot.lane.b32.xlu0 %v329_v13, %s1003_s8  ;;  %340 = vst [vmem:[#allocation1] ss:$2 sm:$0xff] %v252_v0  ;;  %v1168_v13 = vld [vmem:[%s1383_s4 + $0x10] sm:$0xff] }
  0x48   : > { %259 = vrot.lane.b32.xlu2 %v255_v1, %s1004_s9 }
  0x4e   : > { %v341_v15 = vld.sshfl [vmem:[#allocation1] sm:$0xff pattern:$0x75316420]  ;;  %v342_v16 = vld.sshfl [vmem:[#allocation1 + $0x8] sm:$0xff pattern:$0x75316420] }
  0x4f   : > { %335 = vrot.lane.b32.xlu0 %v330_v14, %s1003_s8  ;;  %345 = vrot.lane.b32.xlu1 %v341_v15, %s1005_s10  ;;  %364 = vst [vmem:[#allocation1] ss:$2 sm:$0xff] %v252_v0  ;;  %v1173_v14 = vld [vmem:[%s1383_s4 + $0x18] sm:$0xff] }
  0x56   : > { %v365_v19 = vld.sshfl [vmem:[#allocation1] sm:$0xff pattern:$0x75316420]  ;;  %v366_v20 = vld.sshfl [vmem:[#allocation1 + $0x8] sm:$0xff pattern:$0x75316420] }
  0x57   : > { %261 = vrot.lane.b32.xlu0 %v256_v2, %s1004_s9  ;;  %347 = vrot.lane.b32.xlu1 %v342_v16, %s1005_s10  ;;  %688 = vst [vmem:[#allocation1] ss:$2 sm:$0xff] %v252_v0  ;;  %v1150_v0 = vld [vmem:[%s1383_s4 + $0x28] sm:$0xff] }
  0x5f   : > { %287 = vrot.lane.b32.xlu1 %v282_v6, %s999_s28 }
  0x79   : > { %v276_v18 = vpop.permute.xlu2 %275 }
  0x89   : > { %v298_v23 = vpop.permute.xlu2 %297 }
  0x91   : > { %v274_v22 = vpop.permute.xlu1 %273  ;;  %v310_v26 = vpop.permute.xlu2 %309 }
  0x92   : > { %v278_v54 = vsel %vm277_vm4, %v274_v22, %v276_v18  ;;  %v279_v59 = vsel %vm277_vm4, %v276_v18, %v274_v22 }
  0x93   : > { %v354_v8 = vrot.slane %v279_v59, 4  ;;  %v355_v9 = vrot.slane %v278_v54, 4 }
  0x99   : > { %v1081_v17 = vpop.permute.xlu0 %285 }
  0x9a   : > { %v312_v32 = vpop.permute.xlu2 %311 }
  0x9b   : > { %v314_v35 = vsel %vm313_vm1, %v310_v26, %v312_v32  ;;  %v315_v36 = vsel %vm313_vm1, %v312_v32, %v310_v26 }
  0x9c   : > { %v371_v39 = vrot.slane %v314_v35, 4  ;;  %v372_v40 = vrot.slane %v315_v36, 4 }
  0x9e   : > { %v386_v57 = vsel %vm381_vm6, %v365_v19, %v371_v39  ;;  %v387_v63 = vsel %vm381_vm6, %v366_v20, %v372_v40 }
  0x9f   : > { %v406_v4 = vmul.f32 %v1139_v58, %v386_v57  ;;  %v407_v7 = vmul.f32 %v1150_v0, %v387_v63 }
  0xa1   : > { %v300_v21 = vpop.permute.xlu0 %299 }
  0xa2   : > { %v302_v60 = vsel %vm301_vm5, %v298_v23, %v300_v21  ;;  %v260_v61 = vpop.permute.xlu2 %259  ;;  %v303_v1 = vsel %vm301_vm5, %v300_v21, %v298_v23  ;;  %v1187_v21 = vld [vmem:[%s1383_s4] sm:$0xff]  ;;  %v1193_v23 = vld [vmem:[%s1383_s4 + $0x8] sm:$0xff] }
  0xa3   : > { %v360_v10 = vrot.slane %v303_v1, 4  ;;  %v361_v11 = vrot.slane %v302_v60, 4 }
  0xb1   : > { %v322_v24 = vpop.permute.xlu0 %321  ;;  %v324_v25 = vpop.permute.xlu1 %323 }
  0xb2   : > { %v326_v44 = vsel %vm325_vm2, %v322_v24, %v324_v25  ;;  %v327_v45 = vsel %vm325_vm2, %v324_v25, %v322_v24 }
  0xb9   : > { %v334_v27 = vpop.permute.xlu0 %333 }
  0xc1   : > { %v336_v30 = vpop.permute.xlu0 %335  ;;  %v346_v31 = vpop.permute.xlu1 %345 }
  0xc2   : > { %v338_v33 = vsel %vm337_vm0, %v334_v27, %v336_v30  ;;  %v339_v34 = vsel %vm337_vm0, %v336_v30, %v334_v27  ;;  %v412_v27 = vld [vmem:[%s1380_s1] sm:$0xf] }
  0xc3   : > { %v377_v37 = vrot.slane %v338_v33, 4  ;;  %v378_v38 = vrot.slane %v339_v34, 4 }
  0xc5   : > { %v388_v50 = vsel %vm381_vm6, %v326_v44, %v377_v37  ;;  %v389_v52 = vsel %vm381_vm6, %v327_v45, %v378_v38 }
  0xc6   : > { %v408_v2 = vmul.f32 %v1123_v51, %v388_v50  ;;  %v409_v3 = vmul.f32 %v1129_v53, %v389_v52 }
  0xc9   : > { %v348_v41 = vpop.permute.xlu1 %347  ;;  %v262_v62 = vpop.permute.xlu0 %261 }
  0xca   : > { %v350_v46 = vsel %vm349_vm3, %v346_v31, %v348_v41  ;;  %v351_v47 = vsel %vm349_vm3, %v348_v41, %v346_v31  ;;  %v266_v5 = vsel %vm265_vm8, %v260_v61, %v262_v62  ;;  %v267_v6 = vsel %vm265_vm8, %v262_v62, %v260_v61 }
  0xcb   : > { %v390_v48 = vsel %vm381_vm6, %v350_v46, 1.0  ;;  %v391_v49 = vsel %vm381_vm6, %v351_v47, 1.0  ;;  %v382_v20 = vsel %vm381_vm6, %v267_v6, %v354_v8  ;;  %v383_v22 = vsel %vm381_vm6, %v266_v5, %v355_v9  ;;  %v595_v5 = vld [vmem:[%s1384_s5 + $0x40] sm:$0x1f]  ;;  %v596_v6 = vld [vmem:[%s1384_s5 + $0x48] sm:$0x1f] }
  0xcc   : > { %v410_v55 = vmul.f32 %v1102_v42, %v390_v48  ;;  %v411_v56 = vmul.f32 %v1107_v43, %v391_v49  ;;  %v402_v25 = vmul.f32 %v1187_v21, %v382_v20  ;;  %v403_v26 = vmul.f32 %v1193_v23, %v383_v22 }
  0xce   : > { %944 = vmatpush.msk.msra.mxu0 %vm417_vm7, %v410_v55  ;;  %946 = vmatpush.msk.msra.mxu1 %vm417_vm7, %v411_v56 }
  0xd0   : > { %436 = vmatpush.msra.mxu0 %v408_v2  ;;  %456 = vmatpush.msra.mxu1 %v409_v3 }
  0xd1   : > { %v288_v12 = vpop.permute.xlu1 %287 }
  0xd2   : > { %v290_v15 = vsel %vm289_vm9, %v1081_v17, %v288_v12  ;;  %v291_v16 = vsel %vm289_vm9, %v288_v12, %v1081_v17  ;;  %437 = vmatpush.msra.mxu0 %v406_v4  ;;  %457 = vmatpush.msra.mxu1 %v407_v7 }
  0xd3   : > { %v384_v18 = vsel %vm381_vm6, %v291_v16, %v360_v10  ;;  %v385_v19 = vsel %vm381_vm6, %v290_v15, %v361_v11 }
  0xd4   : > { %v404_v17 = vmul.f32 %v1168_v13, %v384_v18  ;;  %v405_v24 = vmul.f32 %v1173_v14, %v385_v19 }
  0xd6   : > { %438 = vmatpush.msra.mxu0 %v404_v17  ;;  %458 = vmatpush.msra.mxu1 %v405_v24 }
  0xd8   : > { %439 = vmatpush.msra.mxu0 %v402_v25  ;;  %459 = vmatpush.msra.mxu1 %v403_v26 }
  0xd9   : > { %945 = vmatmul.msk.f32.vlgmr.msra.gmra.mxu0 %vm413_vm10, %v412_v27  ;;  %947 = vmatmul.msk.f32.vlgmr.msra.gmra.mxu1 %vm413_vm10, %v412_v27 }
 0x156   : > { %v441_v28 = vpop.f32.mrf.mxu0  ;;  %v461_v30 = vpop.f32.mrf.mxu1 }
 0x157   : > { %v470_v31 = vmul.f32 %v441_v28, %v441_v28  ;;  %v471_v32 = vmul.f32 %v461_v30, %v461_v30  ;;  %v464_v33 = vsel %vm381_vm6, %v441_v28, 0.0  ;;  %v465_v34 = vsel %vm381_vm6, %v461_v30, 0.0 }
 0x158   : > { %v466_v35 = vadd.f32 %v465_v34, %v464_v33 }
 0x159   : > { %v472_v36 = vsel %vm381_vm6, %v470_v31, 0.0  ;;  %v473_v37 = vsel %vm381_vm6, %v471_v32, 0.0  ;;  %v594_v31 = vld [vmem:[%s1384_s5 + $0x38] sm:$0xff] }
 0x15a   : > { %467 = vadd.xlane.f32.xlu1 %v466_v35  ;;  %v474_v38 = vadd.f32 %v473_v37, %v472_v36  ;;  %v591_v37 = vld [vmem:[%s1384_s5 + $0x20] sm:$0xff] }
 0x15c   : > { %475 = vadd.xlane.f32.xlu2 %v474_v38 }
 0x1cd   : > { %v468_v39 = vpop.xlane.xlu1 %467 }
 0x1ce   : > { %v469_v40 = vmul.f32 0.00390625, %v468_v39  ;;  %v592_v39 = vld [vmem:[%s1384_s5 + $0x28] sm:$0xff] }
 0x1cf   : > { %v476_v41 = vpop.xlane.xlu2 %475 }
 0x1d0   : > { %v477_v44 = vmul.f32 0.00390625, %v476_v41  ;;  %v478_v45 = vmul.f32 %v469_v40, %v469_v40  ;;  %v480_v56 = vsub.f32 %v441_v28, %v469_v40  ;;  %v481_v57 = vsub.f32 %v461_v30, %v469_v40  ;;  %v593_v30 = vld [vmem:[%s1384_s5 + $0x30] sm:$0xff] }
 0x1d2   : > { %v479_v46 = vsub.f32 %v477_v44, %v478_v45 }
 0x1d4   : > { %v482_v47 = vadd.f32 1e-05, %v479_v46 }
 0x1d6   : > { %984 = vrsqrt.f32 %v482_v47  ;;  %vm489_vm12 = vweird.f32 %v482_v47 }
 0x1dc   : > { %v985_v48 = vpop.eup %984 }
 0x1dd   : > { %v484_v49 = vmul.f32 %v985_v48, %v482_v47  ;;  %vm490_vm11 = vweird.f32 %v985_v48 }
 0x1de   : > { %vm491_vm13 = vmor %vm489_vm12, %vm490_vm11  ;;  %vm543_vm11 = vcmp.lt.s32.totalorder %v1083_v29, 80  ;;  %vm536_vm12 = vcmp.lt.s32.totalorder %v1083_v29, 83 }
 0x1df   : > { %v485_v50 = vmul.f32 %v985_v48, %v484_v49 }
 0x1e1   : > { %v486_v52 = vmul.f32 0.5, %v485_v50 }
 0x1e3   : > { %v487_v54 = vsub.f32 1.5, %v486_v52 }
 0x1e5   : > { %v488_v55 = vmul.f32 %v985_v48, %v487_v54 }
 0x1e7   : > { %v492_v59 = vsel %vm491_vm13, %v985_v48, %v488_v55  ;;  %vm522_vm13 = vcmp.lt.s32.totalorder %v1083_v29, 3 }
 0x1e8   : > { %v493_v60 = vmul.f32 %v492_v59, %v480_v56  ;;  %v494_v61 = vmul.f32 %v492_v59, %v481_v57  ;;  %v589_v59 = vld [vmem:[%s1384_s5 + $0x10] sm:$0xff] }
 0x1ea   : > { %v1208_v62 = vmax.f32 %v493_v60, 0.0  ;;  %v1210_v63 = vmax.f32 %v494_v61, 0.0  ;;  %v590_v60 = vld [vmem:[%s1384_s5 + $0x18] sm:$0xff] }
 0x1ec   : > { %527 = vrot.lane.b32.xlu2 %v1210_v63, %s1006_s20  ;;  %532 = vrot.lane.b32.xlu1 %v1208_v62, %s1007_s24 }
 0x1ed   : > { %539 = vrot.lane.b32.xlu0 %v1208_v62, %s1008_s25 }
 0x1f4   : > { %504 = vrot.lane.b32.xlu2 %v1208_v62, %s1009_s26  ;;  %506 = vrot.lane.b32.xlu1 %v1210_v63, %s1009_s26 }
 0x1f5   : > { %541 = vrot.lane.b32.xlu0 %v1210_v63, %s1008_s25 }
 0x1fc   : > { %513 = vrot.lane.b32.xlu2 %v1210_v63, %s1010_s11  ;;  %497 = vrot.lane.b32.xlu1 %v1208_v62, %s1011_s12 }
 0x1fd   : > { %546 = vrot.lane.b32.xlu0 %v1208_v62, %s1012_s13 }
 0x205   : > { %548 = vrot.lane.b32.xlu0 %v1210_v63, %s1012_s13 }
 0x20d   : > { %525 = vrot.lane.b32.xlu0 %v1208_v62, %s1006_s20 }
 0x215   : > { %534 = vrot.lane.b32.xlu0 %v1210_v63, %s1007_s24 }
 0x21d   : > { %518 = vrot.lane.b32.xlu0 %v1208_v62, %s1013_s14 }
 0x225   : > { %520 = vrot.lane.b32.xlu0 %v1210_v63, %s1013_s14 }
 0x22d   : > { %511 = vrot.lane.b32.xlu0 %v1208_v62, %s1010_s11 }
 0x235   : > { %499 = vrot.lane.b32.xlu0 %v1210_v63, %s1011_s12 }
 0x246   : > { %v528_v16 = vpop.permute.xlu2 %527 }
 0x24e   : > { %v505_v47 = vpop.permute.xlu2 %504 }
 0x256   : > { %v514_v54 = vpop.permute.xlu2 %513 }
 0x25e   : > { %v533_v25 = vpop.permute.xlu1 %532 }
 0x25f   : > { %v540_v1 = vpop.permute.xlu0 %539 }
 0x266   : > { %v507_v52 = vpop.permute.xlu1 %506 }
 0x267   : > { %v542_v2 = vpop.permute.xlu0 %541 }
 0x268   : > { %v544_v20 = vsel %vm543_vm11, %v540_v1, %v542_v2  ;;  %v545_v22 = vsel %vm543_vm11, %v542_v2, %v540_v1  ;;  %vm501_vm11 = vcmp.lt.s32.totalorder %v1083_v29, 51 }
 0x269   : > { %v573_v26 = vrot.slane %v544_v20, 4  ;;  %v574_v27 = vrot.slane %v545_v22, 4 }
 0x26f   : > { %v547_v3 = vpop.permute.xlu0 %546 }
 0x277   : > { %v549_v4 = vpop.permute.xlu0 %548 }
 0x278   : > { %v551_v7 = vsel %vm550_vm14, %v547_v3, %v549_v4  ;;  %v552_v8 = vsel %vm550_vm14, %v549_v4, %v547_v3  ;;  %vm515_vm14 = vcmp.lt.s32.totalorder %v1083_v29, 45 }
 0x279   : > { %v585_v9 = vsel %vm381_vm6, %v551_v7, 1.0  ;;  %v586_v10 = vsel %vm381_vm6, %v552_v8, 1.0 }
 0x27a   : > { %v605_v11 = vmul.f32 %v595_v5, %v585_v9  ;;  %v606_v12 = vmul.f32 %v596_v6, %v586_v10  ;;  %v498_v10 = vpop.permute.xlu1 %497 }
 0x27c   : > { %948 = vmatpush.msk.msra.mxu2 %vm417_vm7, %v605_v11  ;;  %950 = vmatpush.msk.msra.mxu3 %vm417_vm7, %v606_v12  ;;  %v587_v12 = vld [vmem:[%s1384_s5] sm:$0xff] }
 0x27f   : > { %v526_v15 = vpop.permute.xlu0 %525 }
 0x280   : > { %v530_v18 = vsel %vm529_vm15, %v526_v15, %v528_v16  ;;  %v531_v19 = vsel %vm529_vm15, %v528_v16, %v526_v15  ;;  %vm508_vm15 = vcmp.lt.s32.totalorder %v1083_v29, 48  ;;  %v588_v15 = vld [vmem:[%s1384_s5 + $0x8] sm:$0xff] }
 0x281   : > { %v567_v17 = vrot.slane %v530_v18, 4  ;;  %v568_v24 = vrot.slane %v531_v19, 4  ;;  %v509_v6 = vsel %vm508_vm15, %v505_v47, %v507_v52  ;;  %v510_v7 = vsel %vm508_vm15, %v507_v52, %v505_v47 }
 0x282   : > { %v555_v8 = vrot.slane %v510_v7, 4  ;;  %v556_v9 = vrot.slane %v509_v6, 4 }
 0x283   : > { %v581_v36 = vsel %vm381_vm6, %v1208_v62, %v567_v17  ;;  %v582_v38 = vsel %vm381_vm6, %v1210_v63, %v568_v24  ;;  %v607_v24 = vld [vmem:[%s1381_s2] sm:$0xf] }
 0x284   : > { %v601_v44 = vmul.f32 %v591_v37, %v581_v36  ;;  %v602_v45 = vmul.f32 %v592_v39, %v582_v38 }
 0x287   : > { %v535_v28 = vpop.permute.xlu0 %534 }
 0x288   : > { %v537_v32 = vsel %vm536_vm12, %v533_v25, %v535_v28  ;;  %v538_v33 = vsel %vm536_vm12, %v535_v28, %v533_v25 }
 0x289   : > { %v583_v34 = vsel %vm381_vm6, %v537_v32, %v573_v26  ;;  %v584_v35 = vsel %vm381_vm6, %v538_v33, %v574_v27 }
 0x28a   : > { %v603_v40 = vmul.f32 %v593_v30, %v583_v34  ;;  %v604_v41 = vmul.f32 %v594_v31, %v584_v35 }
 0x28c   : > { %629 = vmatpush.msra.mxu2 %v603_v40  ;;  %649 = vmatpush.msra.mxu3 %v604_v41 }
 0x28e   : > { %630 = vmatpush.msra.mxu2 %v601_v44  ;;  %650 = vmatpush.msra.mxu3 %v602_v45 }
 0x28f   : > { %v519_v46 = vpop.permute.xlu0 %518 }
 0x297   : > { %v521_v48 = vpop.permute.xlu0 %520 }
 0x298   : > { %v523_v49 = vsel %vm522_vm13, %v519_v46, %v521_v48  ;;  %v524_v50 = vsel %vm522_vm13, %v521_v48, %v519_v46 }
 0x299   : > { %v561_v55 = vrot.slane %v524_v50, 4  ;;  %v562_v56 = vrot.slane %v523_v49, 4 }
 0x29f   : > { %v512_v57 = vpop.permute.xlu0 %511 }
 0x2a0   : > { %v516_v61 = vsel %vm515_vm14, %v512_v57, %v514_v54  ;;  %v517_v1 = vsel %vm515_vm14, %v514_v54, %v512_v57 }
 0x2a1   : > { %v579_v2 = vsel %vm381_vm6, %v517_v1, %v561_v55  ;;  %v580_v3 = vsel %vm381_vm6, %v516_v61, %v562_v56  ;;  %v689_v55 = vld.sshfl [vmem:[#allocation1] sm:$0xff pattern:$0x75316420]  ;;  %v690_v56 = vld.sshfl [vmem:[#allocation1 + $0x8] sm:$0xff pattern:$0x75316420] }
 0x2a2   : > { %v599_v4 = vmul.f32 %v589_v59, %v579_v2  ;;  %v600_v5 = vmul.f32 %v590_v60, %v580_v3 }
 0x2a4   : > { %631 = vmatpush.msra.mxu2 %v599_v4  ;;  %651 = vmatpush.msra.mxu3 %v600_v5 }
 0x2a7   : > { %v500_v11 = vpop.permute.xlu0 %499 }
 0x2a8   : > { %v502_v16 = vsel %vm501_vm11, %v498_v10, %v500_v11  ;;  %v503_v18 = vsel %vm501_vm11, %v500_v11, %v498_v10 }
 0x2a9   : > { %v577_v19 = vsel %vm381_vm6, %v503_v18, %v555_v8  ;;  %v578_v20 = vsel %vm381_vm6, %v502_v16, %v556_v9 }
 0x2aa   : > { %v597_v22 = vmul.f32 %v587_v12, %v577_v19  ;;  %v598_v17 = vmul.f32 %v588_v15, %v578_v20 }
 0x2ac   : > { %632 = vmatpush.msra.mxu2 %v597_v22  ;;  %652 = vmatpush.msra.mxu3 %v598_v17 }
 0x2ad   : > { %949 = vmatmul.msk.f32.vlgmr.msra.gmra.mxu2 %vm413_vm10, %v607_v24  ;;  %951 = vmatmul.msk.f32.vlgmr.msra.gmra.mxu3 %vm413_vm10, %v607_v24 }
 0x330   : > { %v634_v25 = vpop.f32.mrf.mxu2  ;;  %v654_v26 = vpop.f32.mrf.mxu3 }
 0x331   : > { %v657_v27 = vsel %vm381_vm6, %v634_v25, 0.0  ;;  %v663_v28 = vmul.f32 %v634_v25, %v634_v25  ;;  %v658_v30 = vsel %vm381_vm6, %v654_v26, 0.0  ;;  %v664_v31 = vmul.f32 %v654_v26, %v654_v26 }
 0x332   : > { %v659_v32 = vadd.f32 %v658_v30, %v657_v27 }
 0x333   : > { %v665_v33 = vsel %vm381_vm6, %v663_v28, 0.0  ;;  %v666_v34 = vsel %vm381_vm6, %v664_v31, 0.0 }
 0x334   : > { %660 = vadd.xlane.f32.xlu2 %v659_v32  ;;  %v667_v35 = vadd.f32 %v666_v34, %v665_v33 }
 0x336   : > { %668 = vadd.xlane.f32.xlu1 %v667_v35 }
 0x3a7   : > { %v661_v36 = vpop.xlane.xlu2 %660 }
 0x3a8   : > { %v662_v37 = vmul.f32 0.00390625, %v661_v36 }
 0x3a9   : > { %v669_v38 = vpop.xlane.xlu1 %668 }
 0x3aa   : > { %v670_v39 = vmul.f32 0.00390625, %v669_v38  ;;  %v671_v40 = vmul.f32 %v662_v37, %v662_v37  ;;  %v673_v52 = vsub.f32 %v634_v25, %v662_v37  ;;  %v674_v54 = vsub.f32 %v654_v26, %v662_v37 }
 0x3ac   : > { %v672_v41 = vsub.f32 %v670_v39, %v671_v40 }
 0x3ae   : > { %v675_v44 = vadd.f32 1e-05, %v672_v41 }
 0x3b0   : > { %986 = vrsqrt.f32 %v675_v44  ;;  %vm682_vm13 = vweird.f32 %v675_v44 }
 0x3b6   : > { %v987_v45 = vpop.eup %986 }
 0x3b7   : > { %v677_v46 = vmul.f32 %v987_v45, %v675_v44  ;;  %vm683_vm12 = vweird.f32 %v987_v45 }
 0x3b8   : > { %vm684_vm14 = vmor %vm682_vm13, %vm683_vm12 }
 0x3b9   : > { %v678_v47 = vmul.f32 %v987_v45, %v677_v46 }
 0x3bb   : > { %v679_v48 = vmul.f32 0.5, %v678_v47 }
 0x3bd   : > { %v680_v49 = vsub.f32 1.5, %v679_v48 }
 0x3bf   : > { %v681_v50 = vmul.f32 %v987_v45, %v680_v49 }
 0x3c1   : > { %v685_v57 = vsel %vm684_vm14, %v987_v45, %v681_v50 }
 0x3c2   : > { %v686_v59 = vmul.f32 %v685_v57, %v673_v52  ;;  %v687_v60 = vmul.f32 %v685_v57, %v674_v54 }
 0x3c4   : > { %v693_v61 = vadd.f32 %v689_v55, %v686_v59  ;;  %v694_v1 = vadd.f32 %v690_v56, %v687_v60 }
 0x3c6   : > { %v695_v2 = vmax.f32 %v693_v61, 0.0  ;;  %v696_v3 = vmax.f32 %v694_v1, 0.0 }
 0x3c8   : > { %723 = vrot.lane.b32.xlu2 %v696_v3, %s1001_s30  ;;  %727 = vrot.lane.b32.xlu1 %v695_v2, %s1002_s7 }
 0x3c9   : > { %733 = vrot.lane.b32.xlu0 %v695_v2, %s1003_s8 }
 0x3d0   : > { %703 = vrot.lane.b32.xlu2 %v695_v2, %s998_s27  ;;  %705 = vrot.lane.b32.xlu1 %v696_v3, %s998_s27 }
 0x3d1   : > { %735 = vrot.lane.b32.xlu0 %v696_v3, %s1003_s8 }
 0x3d8   : > { %711 = vrot.lane.b32.xlu2 %v696_v3, %s999_s28  ;;  %697 = vrot.lane.b32.xlu1 %v695_v2, %s1004_s9 }
 0x3d9   : > { %739 = vrot.lane.b32.xlu0 %v695_v2, %s1005_s10 }
 0x3e1   : > { %741 = vrot.lane.b32.xlu0 %v696_v3, %s1005_s10 }
 0x3e9   : > { %721 = vrot.lane.b32.xlu0 %v695_v2, %s1001_s30 }
 0x3f1   : > { %729 = vrot.lane.b32.xlu0 %v696_v3, %s1002_s7  ;;  %s251_s7 = scalar_lea.vmem %s1385_s6, %s958_s23 }
 0x3f9   : > { %715 = vrot.lane.b32.xlu0 %v695_v2, %s1000_s29 }
 0x401   : > { %717 = vrot.lane.b32.xlu0 %v696_v3, %s1000_s29 }
 0x409   : > { %709 = vrot.lane.b32.xlu0 %v695_v2, %s999_s28 }
 0x411   : > { %699 = vrot.lane.b32.xlu0 %v696_v3, %s1004_s9 }
 0x422   : > { %v724_v18 = vpop.permute.xlu2 %723 }
 0x42a   : > { %v704_v40 = vpop.permute.xlu2 %703 }
 0x432   : > { %v712_v46 = vpop.permute.xlu2 %711 }
 0x43a   : > { %v728_v24 = vpop.permute.xlu1 %727 }
 0x43b   : > { %v734_v4 = vpop.permute.xlu0 %733 }
 0x443   : > { %v736_v5 = vpop.permute.xlu0 %735 }
 0x444   : > { %v737_v22 = vsel %vm337_vm0, %v734_v4, %v736_v5 }
 0x445   : > { %v765_v25 = vrot.slane %v737_v22, 4 }
 0x44b   : > { %v740_v6 = vpop.permute.xlu0 %739 }
 0x453   : > { %v742_v7 = vpop.permute.xlu0 %741 }
 0x454   : > { %v743_v8 = vsel %vm349_vm3, %v740_v6, %v742_v7  ;;  %v744_v9 = vsel %vm349_vm3, %v742_v7, %v740_v6 }
 0x455   : > { %v777_v10 = vsel %vm381_vm6, %v743_v8, 1.0  ;;  %v778_v11 = vsel %vm381_vm6, %v744_v9, 1.0 }
 0x456   : > { %v787_v12 = vmul.f32 %v777_v10, %v1102_v42  ;;  %v788_v15 = vmul.f32 %v778_v11, %v1107_v43  ;;  %v738_v42 = vsel %vm337_vm0, %v736_v5, %v734_v4  ;;  %v789_v5 = vld [vmem:[%s1382_s3] sm:$0xf] }
 0x457   : > { %v766_v26 = vrot.slane %v738_v42, 4 }
 0x458   : > { %952 = vmatpush.msk.msrb.mxu0 %vm417_vm7, %v787_v12  ;;  %954 = vmatpush.msk.msrb.mxu1 %vm417_vm7, %v788_v15 }
 0x45b   : > { %v722_v16 = vpop.permute.xlu0 %721 }
 0x45c   : > { %v725_v19 = vsel %vm313_vm1, %v722_v16, %v724_v18  ;;  %v726_v20 = vsel %vm313_vm1, %v724_v18, %v722_v16 }
 0x45d   : > { %v759_v17 = vrot.slane %v725_v19, 4  ;;  %v760_v43 = vrot.slane %v726_v20, 4 }
 0x45f   : > { %v773_v33 = vsel %vm381_vm6, %v695_v2, %v759_v17  ;;  %v774_v34 = vsel %vm381_vm6, %v696_v3, %v760_v43 }
 0x460   : > { %v783_v37 = vmul.f32 %v773_v33, %v1139_v58  ;;  %v784_v38 = vmul.f32 %v774_v34, %v1150_v0 }
 0x463   : > { %v730_v27 = vpop.permute.xlu0 %729 }
 0x464   : > { %v731_v28 = vsel %vm325_vm2, %v728_v24, %v730_v27  ;;  %v732_v30 = vsel %vm325_vm2, %v730_v27, %v728_v24 }
 0x465   : > { %v775_v31 = vsel %vm381_vm6, %v731_v28, %v765_v25  ;;  %v776_v32 = vsel %vm381_vm6, %v732_v30, %v766_v26 }
 0x466   : > { %v785_v35 = vmul.f32 %v775_v31, %v1123_v51  ;;  %v786_v36 = vmul.f32 %v776_v32, %v1129_v53  ;;  %v706_v51 = vpop.permute.xlu1 %705 }
 0x467   : > { %v707_v55 = vsel %vm277_vm4, %v704_v40, %v706_v51  ;;  %v708_v56 = vsel %vm277_vm4, %v706_v51, %v704_v40 }
 0x468   : > { %811 = vmatpush.msrb.mxu0 %v785_v35  ;;  %831 = vmatpush.msrb.mxu1 %v786_v36  ;;  %v747_v57 = vrot.slane %v708_v56, 4  ;;  %v748_v59 = vrot.slane %v707_v55, 4 }
 0x46a   : > { %812 = vmatpush.msrb.mxu0 %v783_v37  ;;  %832 = vmatpush.msrb.mxu1 %v784_v38 }
 0x46b   : > { %v716_v39 = vpop.permute.xlu0 %715 }
 0x46e   : > { %v698_v60 = vpop.permute.xlu1 %697 }
 0x473   : > { %v718_v41 = vpop.permute.xlu0 %717 }
 0x474   : > { %v719_v44 = vsel %vm301_vm5, %v716_v39, %v718_v41  ;;  %v720_v45 = vsel %vm301_vm5, %v718_v41, %v716_v39 }
 0x475   : > { %v753_v53 = vrot.slane %v720_v45, 4  ;;  %v754_v47 = vrot.slane %v719_v44, 4 }
 0x47b   : > { %v710_v48 = vpop.permute.xlu0 %709 }
 0x47c   : > { %v713_v58 = vsel %vm289_vm9, %v710_v48, %v712_v46  ;;  %v714_v0 = vsel %vm289_vm9, %v712_v46, %v710_v48 }
 0x47d   : > { %v771_v49 = vsel %vm381_vm6, %v714_v0, %v753_v53  ;;  %v772_v50 = vsel %vm381_vm6, %v713_v58, %v754_v47 }
 0x47e   : > { %v781_v52 = vmul.f32 %v771_v49, %v1168_v13  ;;  %v782_v54 = vmul.f32 %v772_v50, %v1173_v14 }
 0x480   : > { %813 = vmatpush.msrb.mxu0 %v781_v52  ;;  %833 = vmatpush.msrb.mxu1 %v782_v54 }
 0x483   : > { %v700_v61 = vpop.permute.xlu0 %699 }
 0x484   : > { %v701_v1 = vsel %vm265_vm8, %v698_v60, %v700_v61  ;;  %v702_v13 = vsel %vm265_vm8, %v700_v61, %v698_v60 }
 0x485   : > { %v769_v14 = vsel %vm381_vm6, %v702_v13, %v747_v57  ;;  %v770_v2 = vsel %vm381_vm6, %v701_v1, %v748_v59 }
 0x486   : > { %v779_v3 = vmul.f32 %v769_v14, %v1187_v21  ;;  %v780_v4 = vmul.f32 %v770_v2, %v1193_v23 }
 0x488   : > { %814 = vmatpush.msrb.mxu0 %v779_v3  ;;  %834 = vmatpush.msrb.mxu1 %v780_v4 }
 0x489   : > { %953 = vmatmul.msk.f32.vlgmr.msrb.gmra.mxu0 %vm413_vm10, %v789_v5  ;;  %955 = vmatmul.msk.f32.vlgmr.msrb.gmra.mxu1 %vm413_vm10, %v789_v5 }
 0x506   : > { %v816_v29 = vpop.f32.mrf.mxu0  ;;  %v836_v6 = vpop.f32.mrf.mxu1 }
 0x507   : > { %v839_v7 = vsel %vm381_vm6, %v816_v29, 0.0  ;;  %v845_v8 = vmul.f32 %v816_v29, %v816_v29  ;;  %v840_v9 = vsel %vm381_vm6, %v836_v6, 0.0  ;;  %v846_v21 = vmul.f32 %v836_v6, %v836_v6 }
 0x508   : > { %v841_v10 = vadd.f32 %v840_v9, %v839_v7 }
 0x509   : > { %v847_v23 = vsel %vm381_vm6, %v845_v8, 0.0  ;;  %v848_v11 = vsel %vm381_vm6, %v846_v21, 0.0 }
 0x50a   : > { %842 = vadd.xlane.f32.xlu2 %v841_v10  ;;  %v849_v12 = vadd.f32 %v848_v11, %v847_v23 }
 0x50c   : > { %850 = vadd.xlane.f32.xlu1 %v849_v12 }
 0x57d   : > { %v843_v15 = vpop.xlane.xlu2 %842 }
 0x57e   : > { %v844_v16 = vmul.f32 0.00390625, %v843_v15 }
 0x57f   : > { %v851_v18 = vpop.xlane.xlu1 %850 }
 0x580   : > { %v852_v19 = vmul.f32 0.00390625, %v851_v18  ;;  %v853_v20 = vmul.f32 %v844_v16, %v844_v16  ;;  %v855_v28 = vsub.f32 %v816_v29, %v844_v16  ;;  %v856_v30 = vsub.f32 %v836_v6, %v844_v16 }
 0x582   : > { %v854_v22 = vsub.f32 %v852_v19, %v853_v20 }
 0x584   : > { %v857_v42 = vadd.f32 1e-05, %v854_v22 }
 0x586   : > { %988 = vrsqrt.f32 %v857_v42  ;;  %vm864_vm1 = vweird.f32 %v857_v42 }
 0x58c   : > { %v989_v17 = vpop.eup %988 }
 0x58d   : > { %v859_v43 = vmul.f32 %v989_v17, %v857_v42  ;;  %vm865_vm0 = vweird.f32 %v989_v17 }
 0x58e   : > { %vm866_vm2 = vmor %vm864_vm1, %vm865_vm0 }
 0x58f   : > { %v860_v24 = vmul.f32 %v989_v17, %v859_v43 }
 0x591   : > { %v861_v25 = vmul.f32 0.5, %v860_v24 }
 0x593   : > { %v862_v26 = vsub.f32 1.5, %v861_v25 }
 0x595   : > { %v863_v27 = vmul.f32 %v989_v17, %v862_v26 }
 0x597   : > { %v867_v31 = vsel %vm866_vm2, %v989_v17, %v863_v27 }
 0x598   : > { %v868_v32 = vmul.f32 %v867_v31, %v855_v28  ;;  %v869_v33 = vmul.f32 %v867_v31, %v856_v30 }
 0x59a   : > { %v870_v34 = vadd.f32 %v868_v32, %v1208_v62  ;;  %v871_v35 = vadd.f32 %v869_v33, %v1210_v63 }
 0x59c   : > { %v873_v36 = vmax.f32 %v871_v35, 0.0  ;;  %v872_v37 = vmax.f32 %v870_v34, 0.0 }
 0x59e   : > { %v876_v38 = vrot.slane %v873_v36, 4 }
 0x5a0   : > { %v877_v39 = vsel %vm381_vm6, %v872_v37, %v876_v38 }
 0x5a1   : > { %879 = vst [vmem:[%s251_s7] sm:$0xff] %v877_v39 }
 0x5a2 PF: > { %s16_s21 = sadd.s32 1, %s996_s21  }
 0x5a3   : > { %p13_p4 = scmp.ge.s32.totalorder %s16_s21, 4  }
 0x5a5   :  { %15 = sbr.rel (!%p13_p4) target bundleno = 1 (0x1), region = 74 }

</bundles_post_ra>
